<compile_context>
chip_gen: v6e
topology: v6e:2x2x1
jax: 0.10.0
libtpu: 0.0.40
codegen_flags: <defaults>
</compile_context>

<pallas_src>
import functools

import jax
import jax.numpy as jnp
from jax.experimental import pallas as pl
from jax.experimental.pallas import tpu as pltpu

_EPS = 1e-6                     # F.pairwise_distance default eps (added to the difference)
_TB_MAX = 1 << 16               # hard ceiling on batch-tile rows per grid step
_DEFAULT_VMEM_CAP = 64 << 20    # conservative fallback = v7x per-TensorCore VMEM


def _round_up(x, m):
    return ((x + m - 1) // m) * m


def _vmem_capacity_bytes():
    """Per-generation VMEM capacity (128 MiB v5e/v6e, 64 MiB v7x); safe fallback."""
    try:
        return int(pltpu.get_tpu_info().vmem_capacity_bytes)
    except Exception:
        return _DEFAULT_VMEM_CAP


def _per_row_inflight_bytes(feat, in_itemsize, label_itemsize):
    """In-flight VMEM bytes per batch row, counting lane padding and pipelining."""
    padded_feat = _round_up(feat, 128)
    return (2 * 2 * padded_feat * in_itemsize   # 2 inputs x 2 pipeline buffers, lane-padded
            + 2 * 128 * label_itemsize          # (TB,1) label block lane-pads to (TB,128), x2 buffers
            + 2 * padded_feat * 4)              # f32 upcast / elementwise temporaries working set


def _pick_batch_tile(batch, feat, in_itemsize, label_itemsize, inflight_budget):
    """Largest TB (multiple of 16) whose in-flight footprint fits the budget,
    kept to >= 2 grid steps and rebalanced for minimal padding."""
    per_row = _per_row_inflight_bytes(feat, in_itemsize, label_itemsize)
    tb = inflight_budget // max(1, per_row)
    tb = max(16, min(_TB_MAX, (tb // 16) * 16))
    if batch > 16:
        # Keep at least 2 grid steps so ("parallel",) can use both v7x TensorCores
        # and the pipeline has something to overlap.
        tb = min(tb, _round_up(-(-batch // 2), 16))
    tb = min(tb, _round_up(batch, 16))
    num_blocks = -(-batch // tb)                 # ceil
    tb = _round_up(-(-batch // num_blocks), 16)  # rebalance -> minimal padding
    num_blocks = -(-batch // tb)
    return tb, num_blocks


def _contrastive_kernel(o1_ref, o2_ref, label_ref, out_ref, *,
                        margin, valid_rows, tile_rows):
    # Upcast AFTER the (possibly bf16) load; all math in f32.
    o1 = o1_ref[...].astype(jnp.float32)                       # (TB, D)
    o2 = o2_ref[...].astype(jnp.float32)                       # (TB, D)
    diff = o1 - o2 + _EPS                                      # (TB, D)
    sq_dist = jnp.sum(diff * diff, axis=-1, keepdims=True)     # (TB, 1)
    dist = jnp.sqrt(sq_dist)                                   # (TB, 1)
    label = label_ref[...].astype(jnp.float32)                 # (TB, 1)

    loss_rows = ((1.0 - label) * sq_dist
                 + label * jnp.square(jnp.maximum(margin - dist, 0.0)))

    # Mask padded rows so the partial sum only counts real batch entries.
    row = (jax.lax.broadcasted_iota(jnp.int32, loss_rows.shape, 0)
           + pl.program_id(0) * tile_rows)
    loss_rows = jnp.where(row < valid_rows, loss_rows, 0.0)

    partial = jnp.sum(loss_rows, axis=0, keepdims=True)        # (1, 1) per-tile sum
    # Lane-dense (8, 128) output block: single unmasked vector store.
    out_ref[...] = jnp.broadcast_to(partial, out_ref.shape)


def contrastive_loss(output1, output2, label, margin=2.0):
    """Pallas TPU forward pass of ContrastiveLoss. Returns a scalar float32."""
    B, D = output1.shape
    assert output2.shape == (B, D)
    if label.ndim == 1:
        label = label[:, None]
    assert label.shape == (B, 1)

    in_itemsize = jnp.dtype(output1.dtype).itemsize
    label_itemsize = jnp.dtype(label.dtype).itemsize

    vmem_cap = _vmem_capacity_bytes()
    # ~Half of physical VMEM for the in-flight tile set, leaving compiler scratch headroom.
    inflight_budget = max(8 << 20, vmem_cap // 2 - (8 << 20))
    tb, num_blocks = _pick_batch_tile(B, D, in_itemsize, label_itemsize, inflight_budget)
    b_pad = tb * num_blocks

    if b_pad != B:
        pad = b_pad - B
        output1 = jnp.pad(output1, ((0, pad), (0, 0)))
        output2 = jnp.pad(output2, ((0, pad), (0, 0)))
        label = jnp.pad(label, ((0, pad), (0, 0)))

    inflight_bytes = (tb * _per_row_inflight_bytes(D, in_itemsize, label_itemsize)
                      + 2 * 8 * 128 * 4)
    vmem_limit = int(min(max(16 << 20, inflight_bytes + (8 << 20)),
                         vmem_cap - (8 << 20)))

    cost = pl.CostEstimate(
        flops=3 * B * D + 10 * B,
        transcendentals=B,  # one sqrt per row
        bytes_accessed=(2 * B * D * in_itemsize
                        + B * label_itemsize
                        + num_blocks * 8 * 128 * 4),
    )

    kernel = functools.partial(_contrastive_kernel, margin=float(margin),
                               valid_rows=B, tile_rows=tb)

    partials = pl.pallas_call(
        kernel,
        out_shape=jax.ShapeDtypeStruct((num_blocks * 8, 128), jnp.float32),
        grid_spec=pltpu.PrefetchScalarGridSpec(
            num_scalar_prefetch=0,
            grid=(num_blocks,),
            in_specs=[
                pl.BlockSpec((tb, D), lambda i: (i, 0)),
                pl.BlockSpec((tb, D), lambda i: (i, 0)),
                pl.BlockSpec((tb, 1), lambda i: (i, 0)),
            ],
            out_specs=pl.BlockSpec((8, 128), lambda i: (i, 0)),
        ),
        compiler_params=pltpu.CompilerParams(
            dimension_semantics=("parallel",),   # megacore-split on v7x
            vmem_limit_bytes=vmem_limit,
        ),
        cost_estimate=cost,
    )(output1, output2, label)

    # num_blocks tiny scalars; divide by the TRUE batch size (padded rows masked in-kernel).
    return jnp.sum(partials[::8, 0]) / B


def _reference_loss(output1, output2, label, margin=2.0):
    # Pure-JAX reference mirroring the PyTorch module.
    diff = output1.astype(jnp.float32) - output2.astype(jnp.float32) + _EPS
    dist = jnp.sqrt(jnp.sum(diff * diff, axis=-1, keepdims=True))
    label = label.astype(jnp.float32)
    return jnp.mean((1.0 - label) * dist ** 2
                    + label * jnp.maximum(margin - dist, 0.0) ** 2)


if __name__ == "__main__":
    key = jax.random.PRNGKey(0)
    k1, k2, k3, k4, k5, k6 = jax.random.split(key, 6)

    # Small, module-consistent shapes: a batch of embedding pairs.
    B, D = 8, 32
    output1 = jax.random.normal(k1, (B, D), dtype=jnp.float32)
    output2 = jax.random.normal(k2, (B, D), dtype=jnp.float32)
    label = jax.random.bernoulli(k3, 0.5, (B, 1)).astype(jnp.float32)

    loss = contrastive_loss(output1, output2, label, margin=2.0)
    jax.block_until_ready(loss)
    ref = _reference_loss(output1, output2, label, margin=2.0)
    assert jnp.allclose(loss, ref, rtol=1e-5, atol=1e-5), (loss, ref)

    # Second check: bf16 ingest + multi-step grid + batch-padding + masking path.
    B2, D2 = 1040, 32
    x1 = jax.random.normal(k4, (B2, D2), dtype=jnp.bfloat16)
    x2 = jax.random.normal(k5, (B2, D2), dtype=jnp.bfloat16)
    lbl = jax.random.bernoulli(k6, 0.5, (B2, 1)).astype(jnp.float32)

    loss2 = contrastive_loss(x1, x2, lbl, margin=2.0)
    jax.block_until_ready(loss2)
    ref2 = _reference_loss(x1, x2, lbl, margin=2.0)
    assert jnp.allclose(loss2, ref2, rtol=1e-4, atol=1e-5), (loss2, ref2)

    print("KERNEL_OK")
</pallas_src>

<mosaic_0001>
module attributes {stable_mosaic.version = 11 : i64} {
  func.func @_contrastive_kernel(%arg0: i32, %arg1: memref<16x32xf32, #tpu.memory_space<vmem>>, %arg2: memref<16x32xf32, #tpu.memory_space<vmem>>, %arg3: memref<16x1xf32, #tpu.memory_space<vmem>>, %arg4: memref<8x128xf32, #tpu.memory_space<vmem>>) attributes {dimension_semantics = [#tpu.dimension_semantics<parallel>], iteration_bounds = array<i64: 1>, scalar_prefetch = 0 : i64, scratch_operands = 0 : i64, tpu.core_type = #tpu.core_type<tc>, window_params = [{transform_indices = @transform_0, window_bounds = array<i64: 16, 32>}, {transform_indices = @transform_1, window_bounds = array<i64: 16, 32>}, {transform_indices = @transform_2, window_bounds = array<i64: 16, 1>}, {transform_indices = @transform_3, window_bounds = array<i64: 8, 128>}]} {
    %c0 = arith.constant 0 : index
    %c0_0 = arith.constant 0 : index
    %0 = vector.load %arg1[%c0, %c0_0] : memref<16x32xf32, #tpu.memory_space<vmem>>, vector<16x32xf32>
    %c0_1 = arith.constant 0 : index
    %c0_2 = arith.constant 0 : index
    %1 = vector.load %arg2[%c0_1, %c0_2] : memref<16x32xf32, #tpu.memory_space<vmem>>, vector<16x32xf32>
    %2 = arith.subf %0, %1 : vector<16x32xf32>
    %cst = arith.constant 9.99999997E-7 : f32
    %3 = vector.broadcast %cst : f32 to vector<16x32xf32>
    %4 = arith.addf %2, %3 : vector<16x32xf32>
    %5 = arith.mulf %4, %4 : vector<16x32xf32>
    %cst_3 = arith.constant dense<0.000000e+00> : vector<16xf32>
    %6 = vector.multi_reduction <add>, %5, %cst_3 [1] : vector<16x32xf32> to vector<16xf32>
    %7 = vector.shape_cast %6 : vector<16xf32> to vector<16x1xf32>
    %8 = math.sqrt %7 : vector<16x1xf32>
    %c0_4 = arith.constant 0 : index
    %c0_5 = arith.constant 0 : index
    %9 = vector.load %arg3[%c0_4, %c0_5] : memref<16x1xf32, #tpu.memory_space<vmem>>, vector<16x1xf32>
    %cst_6 = arith.constant 1.000000e+00 : f32
    %10 = vector.broadcast %cst_6 : f32 to vector<16x1xf32>
    %11 = arith.subf %10, %9 : vector<16x1xf32>
    %12 = arith.mulf %11, %7 : vector<16x1xf32>
    %cst_7 = arith.constant 2.000000e+00 : f32
    %13 = vector.broadcast %cst_7 : f32 to vector<16x1xf32>
    %14 = arith.subf %13, %8 : vector<16x1xf32>
    %cst_8 = arith.constant 0.000000e+00 : f32
    %15 = vector.broadcast %cst_8 : f32 to vector<16x1xf32>
    %16 = arith.maximumf %14, %15 : vector<16x1xf32>
    %17 = arith.mulf %16, %16 : vector<16x1xf32>
    %18 = arith.mulf %9, %17 : vector<16x1xf32>
    %19 = arith.addf %12, %18 : vector<16x1xf32>
    %20 = tpu.iota {dimensions = array<i32: 0>} : vector<16x1xi32>
    %c16_i32 = arith.constant 16 : i32
    %21 = arith.muli %arg0, %c16_i32 : i32
    %22 = vector.broadcast %21 : i32 to vector<16x1xi32>
    %23 = arith.addi %20, %22 : vector<16x1xi32>
    %c8_i32 = arith.constant 8 : i32
    %24 = vector.broadcast %c8_i32 : i32 to vector<16x1xi32>
    %25 = arith.cmpi slt, %23, %24 : vector<16x1xi32>
    %cst_9 = arith.constant 0.000000e+00 : f32
    %26 = vector.broadcast %cst_9 : f32 to vector<16x1xf32>
    %27 = arith.select %25, %19, %26 : vector<16x1xi1>, vector<16x1xf32>
    %cst_10 = arith.constant dense<0.000000e+00> : vector<1xf32>
    %28 = vector.multi_reduction <add>, %27, %cst_10 [0] : vector<16x1xf32> to vector<1xf32>
    %29 = vector.shape_cast %28 : vector<1xf32> to vector<1x1xf32>
    %30 = vector.shape_cast %29 : vector<1x1xf32> to vector<1x1xf32>
    %31 = vector.broadcast %30 : vector<1x1xf32> to vector<8x128xf32>
    %c0_11 = arith.constant 0 : index
    %c0_12 = arith.constant 0 : index
    %32 = vector.load %arg4[%c0_11, %c0_12] : memref<8x128xf32, #tpu.memory_space<vmem>>, vector<8x128xf32>
    tpu.vector_store %arg4[%c0_11, %c0_12], %31 {strides = array<i32>} : memref<8x128xf32, #tpu.memory_space<vmem>>, vector<8x128xf32>,
    return
  }
  func.func @transform_0(%arg0: i32) -> (i32, i32) {
    %c0_i32 = arith.constant 0 : i32
    %c0_i32_0 = arith.constant 0 : i32
    return %arg0, %c0_i32 : i32, i32
  }
  func.func @transform_1(%arg0: i32) -> (i32, i32) {
    %c0_i32 = arith.constant 0 : i32
    %c0_i32_0 = arith.constant 0 : i32
    return %arg0, %c0_i32 : i32, i32
  }
  func.func @transform_2(%arg0: i32) -> (i32, i32) {
    %c0_i32 = arith.constant 0 : i32
    %c0_i32_0 = arith.constant 0 : i32
    return %arg0, %c0_i32 : i32, i32
  }
  func.func @transform_3(%arg0: i32) -> (i32, i32) {
    %c0_i32 = arith.constant 0 : i32
    %c0_i32_0 = arith.constant 0 : i32
    return %arg0, %c0_i32 : i32, i32
  }
}

</mosaic_0001>

<bundles_post_ra>
// kernel: tpu_custom_call.1
= control target key start
LH: loop header
LB: loop body
LE: loop exit
PB: predicated region body
PF: predicated region fallthrough
CT: control target
= control target key end

     0   :  { %8 = vsyncpa [#allocation3], 0  ;;  %s207_s0 = inlined_call_operand.vmem [shape: f32[16,32], index: 0, kind: input, shape index: {}]   ;;  %s208_s1 = inlined_call_operand.hbm [shape: f32[16,32], index: 1, kind: input, shape index: {}]   ;;  %s209_s2 = inlined_call_operand.vmem [shape: f32[16,1], index: 2, kind: input, shape index: {}]   ;;  %s210_s3 = inlined_call_operand.hbm [shape: f32[8,128], index: 3, kind: output, shape index: {}]  }
   0x1   :  { %9 = vsyncpa [#allocation4], 0  ;;  %s170_s12 = smov [#allocation2]  }
   0x2   :  { %s17_s13 = sshll.u32 %s170_s12, 4  ;;  %s18_s13 = int_to_ptr.vmem [resolvable:$true] %s17_s13 }
   0x3   :  { %s134_s14 = scalar_lea.vmem %s18_s13, 256  ;;  %p139_p1 = scmp.lt.s32.totalorder %s18_s13, %s18_s13 }
   0x4   :  { %p135_p0 = scmp.ne.s32.totalorder %s18_s13, %s134_s14  ;;  %p140_p2 = scmp.lt.s32.totalorder %s134_s14, %s134_s14 }
   0x6   :  { %p141_p3 = por %p140_p2, %p139_p1 }
   0x8   :  { %p142_p4 = pnand %p141_p3, %p135_p0 }
   0xa   :  { %145 = shalt.err (!%p142_p4)
}
   0xb   :  { %s171_s15 = smov 128   ;;  %s172_s16 = smov 8  }
   0xc   :  { %23 = dma.hbm_to_vmem [thread:$0]  %s208_s1, 256, %s18_s13, [#allocation3], %s171_s15, %s171_s15, %s172_s16  }
   0xd   :  { %166 = dma.done.wait [#allocation3], 256  }
   0xe   :  { %167 = vsyncadd [#allocation3], 4294967040  ;;  %v29_v0 = vld [vmem:[%s207_s0] sm:$0xff]  ;;  %vm39_vm0 = vcmask 261120   ;;  %v173_v6 = vmov 0   ;;  %vm87_vm3 = vcmask 7168  }
   0xf   :  { %v31_v1 = vld [vmem:[#allocation2] sm:$0xff]  ;;  %123 = vset.pattern.permute.xlu0 %v173_v6  ;;  %s174_s21 = smov [#allocation5]  }
  0x10   :  { %v33_v2 = vsub.f32 %v29_v0, %v31_v1  ;;  %v60_v13 = vld [vmem:[%s209_s2] sm:$0xff]  ;;  %s109_s22 = sshll.u32 %s174_s21, 4  ;;  %s110_s22 = int_to_ptr.vmem [resolvable:$true] %s109_s22 }
  0x11   :  { %v62_v15 = vsub.f32 1.0, %v60_v13  ;;  %s146_s2 = scalar_lea.vmem %s110_s22, 128  ;;  %p151_p6 = scmp.lt.s32.totalorder %s110_s22, %s110_s22 }
  0x12   :  { %v35_v3 = vadd.f32 1e-06, %v33_v2  ;;  %p147_p5 = scmp.ne.s32.totalorder %s110_s22, %s146_s2  ;;  %p152_p7 = scmp.lt.s32.totalorder %s146_s2, %s146_s2 }
  0x14   :  { %v37_v4 = vmul.f32 %v35_v3, %v35_v3  ;;  %p153_p8 = por %p152_p7, %p151_p6 }
  0x16   :  { %v40_v5 = vsel %vm39_vm0, %v37_v4, 0.0  ;;  %p154_p9 = pnand %p153_p8, %p147_p5 }
  0x17   :  { %41 = vadd.xlane.f32.xlu0 %v40_v5 }
  0xa0   :  { %v42_v7 = vpop.xlane.xlu0 %41 }
  0xa1   :  { %124 = vrsqrt.f32 %v42_v7  ;;  %vm48_vm1 = vcmp.eq.f32.partialorder %v42_v7, inf  ;;  %v51_v10 = vand.u32 2147483648, %v42_v7  ;;  %vm50_vm2 = vcmp.eq.f32.partialorder %v42_v7, 0.0 }
  0xa2   :  { %v64_v18 = vmul.f32 %v62_v15, %v42_v7 }
  0xae   :  { %v125_v8 = vpop.eup %124 }
  0xaf   :  { %v47_v9 = vmul.f32 %v125_v8, %v42_v7 }
  0xb1   :  { %v49_v11 = vsel %vm48_vm1, %v42_v7, %v47_v9 }
  0xb2   :  { %v52_v12 = vsel %vm50_vm2, %v51_v10, %v49_v11 }
  0xb3   :  { %v66_v14 = vsub.f32 2.0, %v52_v12 }
  0xb5   :  { %v68_v16 = vmax.f32 %v66_v14, 0.0 }
  0xb7   :  { %v70_v17 = vmul.f32 %v68_v16, %v68_v16 }
  0xb9   :  { %v72_v19 = vmul.f32 %v70_v17, %v60_v13 }
  0xbb   :  { %v74_v20 = vadd.f32 %v72_v19, %v64_v18 }
  0xbd   :  { %v88_v21 = vsel %vm87_vm3, %v74_v20, 0.0 }
  0xbe   :  { %v91_v22 = vrot.slane %v88_v21, 4 }
  0xc0   :  { %v92_v23 = vadd.f32 %v91_v22, %v88_v21 }
  0xc2   :  { %v93_v24 = vrot.slane %v92_v23, 2 }
  0xc4   :  { %v94_v25 = vadd.f32 %v93_v24, %v92_v23 }
  0xc6   :  { %v95_v26 = vrot.slane %v94_v25, 1 }
  0xc8   :  { %v96_v27 = vadd.f32 %v95_v26, %v94_v25 }
  0xca   :  { %99 = vperm.xlu0 %123, %v96_v27  }
 0x145   :  { %v100_v28 = vpop.permute.xlu0 %99 }
 0x146   :  { %102 = vst [vmem:[#allocation5] sm:$0xff] %v100_v28 }
 0x147   :  { %157 = shalt.err (!%p154_p9)
}
 0x148   :  { %112 = dma.vmem_to_hbm [thread:$0]  %s110_s22, 128, %s210_s3, [#allocation4]  }
 0x149   :  { %168 = dma.done.wait [#allocation4], 128  }
 0x14a   :  { %169 = vsyncadd [#allocation4], 4294967168 }
 0x14b   :  { %116 = vsyncpa [#allocation3], 1 }
 0x14c   :  { %117 = vsyncpa [#allocation4], 1 }

</bundles_post_ra>
